<compile_context>
chip_gen: v7x
topology: tpu7x:2x2x1
jax: 0.10.0
libtpu: 0.0.40
codegen_flags: <defaults>
</compile_context>

<pallas_src>
import functools

import jax
import jax.numpy as jnp
from jax.experimental import pallas as pl
from jax.experimental.pallas import tpu as pltpu


def make_divisible(v, divisor=8, min_val=None):
    if min_val is None:
        min_val = divisor
    new_v = max(min_val, int(v + divisor / 2) // divisor * divisor)
    if new_v < 0.9 * v:
        new_v += divisor
    return new_v


def _ceil_div(a, b):
    return -(-a // b)


def _round_up(a, b):
    return _ceil_div(a, b) * b


def _vmem_budget():
    """(max_slab_bytes, vmem_limit_bytes), generation-aware.

    Footprint of the fused path is ~4 x slab (double-buffered input + output)
    plus tiny weights, so max_slab is ~1/4 of the usable VMEM budget.
    """
    vmem_cap = 64 * 1024 * 1024  # conservative default == v7x (64 MiB / TC)
    try:
        info = pltpu.get_tpu_info()
        vmem_cap = int(getattr(info, "vmem_capacity_bytes", vmem_cap))
    except Exception:
        pass
    if vmem_cap >= 100 * 1024 * 1024:
        # v5e / v6e: 128 MiB physical VMEM; scoped default (16/32 MiB) is far
        # below that, so the explicit limit is mandatory (esp. v5e).
        return 16 * 1024 * 1024, 96 * 1024 * 1024
    # v7x: 64 MiB per TensorCore -> keep 4 x slab + weights <= ~48 MiB.
    return 10 * 1024 * 1024, 48 * 1024 * 1024


# ---------------------------------------------------------------------------
# Fused single-pass kernel: block = (Nb, C, S), batch folded into the block.
# ---------------------------------------------------------------------------
def _se_fused_kernel(x_ref, w1t_ref, b1_ref, w2t_ref, b2_ref, o_ref):
    # x: (Nb, C, S)   w1t: (C, M) (pre-scaled by 1/S)   b1: (1, M)
    # w2t: (M, C)     b2: (1, C)
    x = x_ref[...]
    # Pool in f32 so bf16 activations with large S do not lose precision.
    pooled = jnp.sum(x.astype(jnp.float32), axis=-1)                 # (Nb, C)
    h = jnp.dot(pooled, w1t_ref[...],
                preferred_element_type=jnp.float32) + b1_ref[...]    # (Nb, M)
    h = jnp.maximum(h, 0.0)
    y = jnp.dot(h, w2t_ref[...],
                preferred_element_type=jnp.float32) + b2_ref[...]    # (Nb, C)
    y = jnp.clip(y + 3.0, 0.0, 6.0) * (1.0 / 6.0)                    # Hsigmoid
    # Final scale stays in the input dtype.
    o_ref[...] = (x * y.astype(x.dtype)[:, :, None]).astype(o_ref.dtype)


# ---------------------------------------------------------------------------
# Two-pass kernels (large-S fallback).
# ---------------------------------------------------------------------------
def _pool_kernel(x_ref, sum_ref, *, st, rem):
    # x: (Nb2, C, st); sum: (Nb2, C, 1) accumulated (f32) across the s axis.
    @pl.when(pl.program_id(1) == 0)
    def _():
        sum_ref[...] = jnp.zeros_like(sum_ref)

    x = x_ref[...].astype(jnp.float32)
    if rem != st:
        # Last s-tile is partial: mask out-of-range lanes so garbage reads do
        # not corrupt the channel sums.  (Static check: rem is compile-time.)
        lane = jax.lax.broadcasted_iota(jnp.int32, x.shape, dimension=2)
        valid = jnp.where(pl.program_id(1) == pl.num_programs(1) - 1, rem, st)
        x = jnp.where(lane < valid, x, 0.0)
    sum_ref[...] += jnp.sum(x, axis=-1, keepdims=True)
    # TODO(synk): if profiling shows this pass XLU/store-bound on v5e, keep a
    # lane-parallel (Nb2, C, 128) partial-sum scratch and reduce once at the end.


def _scale_kernel(x_ref, y_ref, o_ref):
    # x: (Nb2, C, st); y: (Nb2, C, 1) per-channel scale broadcast over lanes.
    # Garbage lanes/rows of a partial edge block only feed dropped writes.
    o_ref[...] = (x_ref[...] * y_ref[...].astype(x_ref.dtype)).astype(o_ref.dtype)


def _pick_batch_tile(n, item_bytes, max_slab_bytes):
    """Batch rows per fused block (0 => even a single row exceeds the budget)."""
    if item_bytes > max_slab_bytes:
        return 0
    nb = min(n, max(1, max_slab_bytes // item_bytes))
    if n > 1:
        # v7x has 2 TensorCores sharing the "parallel" axis: keep >= 2 steps.
        nb = min(nb, _ceil_div(n, 2))
        # Best effort: prefer an even number of steps, but never shrink the
        # slab below half of what the budget allows.
        if _ceil_div(n, nb) % 2 == 1:
            for cand in range(nb, 0, -1):
                if _ceil_div(n, cand) % 2 == 0 and cand * 2 >= nb:
                    nb = cand
                    break
    return nb


def se_module(x, w1, b1, w2, b2, *, force_two_pass=False, interpret=False):
    """SE block. x: (N, C, D, H, W); w1: (M, C); b1: (M,); w2: (C, M); b2: (C,)."""
    N, C, D, H, W = x.shape
    S = D * H * W
    M = w1.shape[0]
    x_flat = x.reshape(N, C, S)
    itemsize = x.dtype.itemsize

    # Host-side weight prep: fold the pooling 1/S into W1 and pre-transpose so
    # the in-kernel FC is (Nb, C) @ (C, M) and (Nb, M) @ (M, C).
    w1t = (w1.astype(jnp.float32) / float(S)).T        # (C, M)
    w2t = w2.astype(jnp.float32).T                     # (M, C)
    b1r = b1.reshape(1, M).astype(jnp.float32)
    b2r = b2.reshape(1, C).astype(jnp.float32)

    max_slab_bytes, vmem_limit = _vmem_budget()
    vmem_params = dict(vmem_limit_bytes=vmem_limit)

    item_bytes = C * S * itemsize
    nb = 0 if force_two_pass else _pick_batch_tile(N, item_bytes, max_slab_bytes)

    if nb > 0:
        # ---------------- fused single-pass path ----------------
        grid = (_ceil_div(N, nb),)   # partial last batch block allowed
        out = pl.pallas_call(
            _se_fused_kernel,
            out_shape=jax.ShapeDtypeStruct((N, C, S), x.dtype),
            grid_spec=pltpu.PrefetchScalarGridSpec(
                num_scalar_prefetch=0,
                grid=grid,
                in_specs=[
                    pl.BlockSpec((nb, C, S), lambda i: (i, 0, 0)),
                    pl.BlockSpec((C, M), lambda i: (0, 0)),   # constant maps:
                    pl.BlockSpec((1, M), lambda i: (0, 0)),   # weights fetched once
                    pl.BlockSpec((M, C), lambda i: (0, 0)),
                    pl.BlockSpec((1, C), lambda i: (0, 0)),
                ],
                out_specs=pl.BlockSpec((nb, C, S), lambda i: (i, 0, 0)),
            ),
            compiler_params=pltpu.CompilerParams(
                dimension_semantics=("parallel",), **vmem_params),
            interpret=interpret,
        )(x_flat, w1t, b1r, w2t, b2r)
        return out.reshape(N, C, D, H, W)

    # ---------------- two-pass path (S too large for a fused slab) ----------
    # Lane-dense spatial tile (multiple of 128), as large as the budget allows
    # (capped at 8192 lanes); fold batch rows into the block too.  No host-side
    # pad / output slice: cdiv grids + pool-side lane masking handle the edges.
    lane_row_bytes = C * itemsize
    st_cap = max(128, (max_slab_bytes // lane_row_bytes) // 128 * 128)
    st = min(_round_up(S, 128), min(st_cap, 8192))
    n_s = _ceil_div(S, st)
    rem = S - (n_s - 1) * st            # valid lanes in the last s-tile
    block_bytes = C * st * itemsize
    nb2 = min(N, max(1, max_slab_bytes // block_bytes))
    n_b = _ceil_div(N, nb2)

    # Pass 1: tiled global-sum pool over S (f32 accumulation).
    pooled = pl.pallas_call(
        functools.partial(_pool_kernel, st=st, rem=rem),
        out_shape=jax.ShapeDtypeStruct((N, C, 1), jnp.float32),
        grid_spec=pltpu.PrefetchScalarGridSpec(
            num_scalar_prefetch=0,
            grid=(n_b, n_s),
            in_specs=[pl.BlockSpec((nb2, C, st), lambda n, s: (n, 0, s))],
            out_specs=pl.BlockSpec((nb2, C, 1), lambda n, s: (n, 0, 0)),
        ),
        compiler_params=pltpu.CompilerParams(
            dimension_semantics=("parallel", "arbitrary"), **vmem_params),
        interpret=interpret,
    )(x_flat)

    # Tiny post-pool FC (O(N*C) FLOPs) in plain XLA.
    p = pooled[:, :, 0]                                           # (N, C) sums
    h = jnp.maximum(p @ w1t + b1r, 0.0)                           # (N, M)
    y = jnp.clip(h @ w2t + b2r + 3.0, 0.0, 6.0) * (1.0 / 6.0)     # (N, C)
    y = y.reshape(N, C, 1).astype(jnp.float32)

    # Pass 2: lane-dense elementwise channel scale; fully parallel grid.
    out = pl.pallas_call(
        _scale_kernel,
        out_shape=jax.ShapeDtypeStruct((N, C, S), x.dtype),
        grid_spec=pltpu.PrefetchScalarGridSpec(
            num_scalar_prefetch=0,
            grid=(n_b, n_s),
            in_specs=[
                pl.BlockSpec((nb2, C, st), lambda n, s: (n, 0, s)),
                pl.BlockSpec((nb2, C, 1), lambda n, s: (n, 0, 0)),
            ],
            out_specs=pl.BlockSpec((nb2, C, st), lambda n, s: (n, 0, s)),
        ),
        compiler_params=pltpu.CompilerParams(
            dimension_semantics=("parallel", "parallel"), **vmem_params),
        interpret=interpret,
    )(x_flat, y)
    return out.reshape(N, C, D, H, W)


def reference_se(x, w1, b1, w2, b2):
    # Pure-JAX reference for the same math (SEModule forward).
    pooled = jnp.mean(x, axis=(2, 3, 4))                          # (N, C)
    h = jnp.maximum(pooled @ w1.T + b1, 0.0)                      # (N, M)
    y = jnp.clip(h @ w2.T + b2 + 3.0, 0.0, 6.0) / 6.0             # (N, C)
    return x * y[:, :, None, None, None]


if __name__ == "__main__":
    key = jax.random.PRNGKey(0)
    # Shapes consistent with MBConvLayer(use_se=True): SE runs on feature_dim
    # channels after the depthwise conv; feature_dim=16 -> num_mid=8.
    N, C, D, H, W = 4, 16, 4, 8, 8
    reduction = 4
    M = make_divisible(C // reduction)            # = 8

    kx, kw1, kb1, kw2, kb2 = jax.random.split(key, 5)
    x = jax.random.normal(kx, (N, C, D, H, W), dtype=jnp.float32)
    # Conv3d(C, M, 1) weights collapse to (M, C); Conv3d(M, C, 1) -> (C, M)
    w1 = jax.random.normal(kw1, (M, C), dtype=jnp.float32) * 0.1
    b1 = jax.random.normal(kb1, (M,), dtype=jnp.float32) * 0.1
    w2 = jax.random.normal(kw2, (C, M), dtype=jnp.float32) * 0.1
    b2 = jax.random.normal(kb2, (C,), dtype=jnp.float32) * 0.1

    ref = reference_se(x, w1, b1, w2, b2)

    out_fused = se_module(x, w1, b1, w2, b2)
    jax.block_until_ready(out_fused)
    assert jnp.allclose(out_fused, ref, atol=1e-5, rtol=1e-5), "fused mismatch"

    out_two_pass = se_module(x, w1, b1, w2, b2, force_two_pass=True)
    jax.block_until_ready(out_two_pass)
    assert jnp.allclose(out_two_pass, ref, atol=1e-5, rtol=1e-5), "two-pass mismatch"

    print("KERNEL_OK")
</pallas_src>

<mosaic_0001>
module attributes {stable_mosaic.version = 11 : i64} {
  func.func @_se_fused_kernel(%arg0: i32, %arg1: memref<2x16x256xf32, #tpu.memory_space<vmem>>, %arg2: memref<16x8xf32, #tpu.memory_space<vmem>>, %arg3: memref<1x8xf32, #tpu.memory_space<vmem>>, %arg4: memref<8x16xf32, #tpu.memory_space<vmem>>, %arg5: memref<1x16xf32, #tpu.memory_space<vmem>>, %arg6: memref<2x16x256xf32, #tpu.memory_space<vmem>>) attributes {dimension_semantics = [#tpu.dimension_semantics<parallel>], iteration_bounds = array<i64: 2>, scalar_prefetch = 0 : i64, scratch_operands = 0 : i64, tpu.core_type = #tpu.core_type<tc>, window_params = [{transform_indices = @transform_0, window_bounds = array<i64: 2, 16, 256>}, {pipeline_mode = #tpu.pipeline_mode<synchronous>, transform_indices = @transform_1, window_bounds = array<i64: 16, 8>}, {pipeline_mode = #tpu.pipeline_mode<synchronous>, transform_indices = @transform_2, window_bounds = array<i64: 1, 8>}, {pipeline_mode = #tpu.pipeline_mode<synchronous>, transform_indices = @transform_3, window_bounds = array<i64: 8, 16>}, {pipeline_mode = #tpu.pipeline_mode<synchronous>, transform_indices = @transform_4, window_bounds = array<i64: 1, 16>}, {transform_indices = @transform_5, window_bounds = array<i64: 2, 16, 256>}]} {
    %c0 = arith.constant 0 : index
    %c0_0 = arith.constant 0 : index
    %c0_1 = arith.constant 0 : index
    %0 = vector.load %arg1[%c0, %c0_0, %c0_1] : memref<2x16x256xf32, #tpu.memory_space<vmem>>, vector<2x16x256xf32>
    %cst = arith.constant dense<0.000000e+00> : vector<2x16xf32>
    %1 = vector.multi_reduction <add>, %0, %cst [2] : vector<2x16x256xf32> to vector<2x16xf32>
    %c0_2 = arith.constant 0 : index
    %c0_3 = arith.constant 0 : index
    %2 = vector.load %arg2[%c0_2, %c0_3] : memref<16x8xf32, #tpu.memory_space<vmem>>, vector<16x8xf32>
    %cst_4 = arith.constant dense<0.000000e+00> : vector<2x8xf32>
    %3 = tpu.matmul %1, %2, %cst_4 {dimension_numbers = #tpu.dot_dimension_numbers<[1], [0], [0], [1], [0, 0, 1, 1], [], []>} : vector<2x16xf32>, vector<16x8xf32>, vector<2x8xf32> -> vector<2x8xf32>
    %c0_5 = arith.constant 0 : index
    %c0_6 = arith.constant 0 : index
    %4 = vector.load %arg3[%c0_5, %c0_6] : memref<1x8xf32, #tpu.memory_space<vmem>>, vector<1x8xf32>
    %5 = vector.broadcast %4 : vector<1x8xf32> to vector<2x8xf32>
    %6 = arith.addf %3, %5 : vector<2x8xf32>
    %cst_7 = arith.constant 0.000000e+00 : f32
    %7 = vector.broadcast %cst_7 : f32 to vector<2x8xf32>
    %8 = arith.maximumf %6, %7 : vector<2x8xf32>
    %c0_8 = arith.constant 0 : index
    %c0_9 = arith.constant 0 : index
    %9 = vector.load %arg4[%c0_8, %c0_9] : memref<8x16xf32, #tpu.memory_space<vmem>>, vector<8x16xf32>
    %cst_10 = arith.constant dense<0.000000e+00> : vector<2x16xf32>
    %10 = tpu.matmul %8, %9, %cst_10 {dimension_numbers = #tpu.dot_dimension_numbers<[1], [0], [0], [1], [0, 0, 1, 1], [], []>} : vector<2x8xf32>, vector<8x16xf32>, vector<2x16xf32> -> vector<2x16xf32>
    %c0_11 = arith.constant 0 : index
    %c0_12 = arith.constant 0 : index
    %11 = vector.load %arg5[%c0_11, %c0_12] : memref<1x16xf32, #tpu.memory_space<vmem>>, vector<1x16xf32>
    %12 = vector.broadcast %11 : vector<1x16xf32> to vector<2x16xf32>
    %13 = arith.addf %10, %12 : vector<2x16xf32>
    %cst_13 = arith.constant 3.000000e+00 : f32
    %14 = vector.broadcast %cst_13 : f32 to vector<2x16xf32>
    %15 = arith.addf %13, %14 : vector<2x16xf32>
    %cst_14 = arith.constant 0.000000e+00 : f32
    %cst_15 = arith.constant 6.000000e+00 : f32
    %16 = vector.broadcast %cst_14 : f32 to vector<2x16xf32>
    %17 = arith.maximumf %16, %15 : vector<2x16xf32>
    %18 = vector.broadcast %cst_15 : f32 to vector<2x16xf32>
    %19 = arith.minimumf %18, %17 : vector<2x16xf32>
    %cst_16 = arith.constant 0.166666672 : f32
    %20 = vector.broadcast %cst_16 : f32 to vector<2x16xf32>
    %21 = arith.mulf %19, %20 : vector<2x16xf32>
    %22 = vector.shape_cast %21 : vector<2x16xf32> to vector<2x16x1xf32>
    %23 = vector.broadcast %22 : vector<2x16x1xf32> to vector<2x16x256xf32>
    %24 = arith.mulf %0, %23 : vector<2x16x256xf32>
    %c0_17 = arith.constant 0 : index
    %c0_18 = arith.constant 0 : index
    %c0_19 = arith.constant 0 : index
    %25 = vector.load %arg6[%c0_17, %c0_18, %c0_19] : memref<2x16x256xf32, #tpu.memory_space<vmem>>, vector<2x16x256xf32>
    tpu.vector_store %arg6[%c0_17, %c0_18, %c0_19], %24 {strides = array<i32>} : memref<2x16x256xf32, #tpu.memory_space<vmem>>, vector<2x16x256xf32>,
    return
  }
  func.func @transform_0(%arg0: i32) -> (i32, i32, i32) {
    %c0_i32 = arith.constant 0 : i32
    %c0_i32_0 = arith.constant 0 : i32
    %c0_i32_1 = arith.constant 0 : i32
    return %arg0, %c0_i32, %c0_i32_0 : i32, i32, i32
  }
  func.func @transform_1(%arg0: i32) -> (i32, i32) {
    %c0_i32 = arith.constant 0 : i32
    %c0_i32_0 = arith.constant 0 : i32
    %c0_i32_1 = arith.constant 0 : i32
    return %c0_i32, %c0_i32_0 : i32, i32
  }
  func.func @transform_2(%arg0: i32) -> (i32, i32) {
    %c0_i32 = arith.constant 0 : i32
    %c0_i32_0 = arith.constant 0 : i32
    %c0_i32_1 = arith.constant 0 : i32
    return %c0_i32, %c0_i32_0 : i32, i32
  }
  func.func @transform_3(%arg0: i32) -> (i32, i32) {
    %c0_i32 = arith.constant 0 : i32
    %c0_i32_0 = arith.constant 0 : i32
    %c0_i32_1 = arith.constant 0 : i32
    return %c0_i32, %c0_i32_0 : i32, i32
  }
  func.func @transform_4(%arg0: i32) -> (i32, i32) {
    %c0_i32 = arith.constant 0 : i32
    %c0_i32_0 = arith.constant 0 : i32
    %c0_i32_1 = arith.constant 0 : i32
    return %c0_i32, %c0_i32_0 : i32, i32
  }
  func.func @transform_5(%arg0: i32) -> (i32, i32, i32) {
    %c0_i32 = arith.constant 0 : i32
    %c0_i32_0 = arith.constant 0 : i32
    %c0_i32_1 = arith.constant 0 : i32
    return %arg0, %c0_i32, %c0_i32_0 : i32, i32, i32
  }
}

</mosaic_0001>

<bundles_post_ra>
// kernel: tpu_custom_call.1
= control target key start
LH: loop header
LB: loop body
LE: loop exit
PB: predicated region body
PF: predicated region fallthrough
CT: control target
= control target key end

     0   :  { %10 = vsyncpa [#allocation3], 0  ;;  %s1036_s0 = inlined_call_operand.hbm [shape: f32[4,16,256], index: 0, kind: input, shape index: {}]   ;;  %s1037_s1 = inlined_call_operand.vmem [shape: f32[16,8], index: 1, kind: input, shape index: {}]   ;;  %s1038_s2 = inlined_call_operand.vmem [shape: f32[1,8], index: 2, kind: input, shape index: {}]   ;;  %s1039_s3 = inlined_call_operand.vmem [shape: f32[8,16], index: 3, kind: input, shape index: {}]   ;;  %s1040_s4 = inlined_call_operand.vmem [shape: f32[1,16], index: 4, kind: input, shape index: {}]   ;;  %s1041_s5 = inlined_call_operand.hbm [shape: f32[4,16,256], index: 5, kind: output, shape index: {}]  }
   0x1   :  { %12 = vsyncpa [#allocation3 + $0x1], 0 }
   0x2   :  { %13 = vsyncpa [#allocation4], 0 }
   0x3   :  { %15 = vsyncpa [#allocation4 + $0x1], 0  ;;  %s823_s18 = smov 0   ;;  %s825_s19 = smov 0  }
   0x4   :  { %s827_s20 = smov 0   ;;  %s829_s21 = smov 0  }
   0x5 LB: > { %s844_s22 = sadd.s32 4294967295, %s782_s21   ;;  %s589_s23 = sadd.s32 4294967294, %s782_s21   ;;  %s782_s21 = sphi %s829_s21, %s1054_s21   ;;  %s778_s20 = sphi %s827_s20, %s1053_s20   ;;  %s774_s19 = sphi %s825_s19, %s1052_s19   ;;  %s770_s18 = sphi %s823_s18, %s1051_s18  }
   0x6   : > { %s848_s24 = sadd.s32 1, %s782_s21   ;;  %s28_s25 = sadd.s32 1, %s778_s20 }
   0x7   : > { %s25_s26 = ssub.s32 %s782_s21, %s848_s24  ;;  %p35_p0 = scmp.ne.s32.totalorder %s778_s20, %s774_s19 }
   0x8   : > { %p26_p1 = scmp.eq.s32.totalorder %s25_s26, 0  ;;  %p36_p2 = scmp.eq.s32.totalorder %s782_s21, 0 }
   0x9   : > { %p41_p3 = scmp.ne.s32.totalorder %s774_s19, %s770_s18  ;;  %p42_p4 = scmp.eq.s32.totalorder %s844_s22, 0 }
   0xa   : > { %s860_s27 = scalar_select %p26_p1, %s778_s20, %s28_s25  }
   0xb   : > { %p862_p5 = por %p36_p2, %p35_p0  ;;  %p866_p6 = por %p42_p4, %p41_p3 }
   0xc   : > { %p149_p7 = scmp.eq.s32.totalorder %s844_s22, 1  ;;  %p155_p8 = scmp.eq.s32.totalorder %s589_s23, 1 }
   0xd   : > { %p645_p10 = scmp.lt.s32.totalorder %s782_s21, 2  ;;  %s187_s7 = sand.u32 1, %s778_s20  }
   0xe   : > { %p873_p11 = por %p149_p7, %p35_p0  ;;  %p877_p12 = por %p155_p8, %p41_p3 }
   0xf   : > { %s610_s8 = sshll.u32 %s782_s21, 10  ;;  %s592_s9 = sshll.u32 %s187_s7, 6 }
  0x10   : > { %s1045_s30 = scalar_select %p873_p11, 1, 0 }
  0x11   : > { %s1046_s6 = scalar_select %p877_p12, 1, 0 }
  0x12   : > { %s886_s12 = scalar_lea.hbm %s1036_s0, %s610_s8  ;;  %s191_s13 = scalar_lea.vmem [#allocation2], %s592_s9 }
  0x13   : > { %s199_s14 = sshll.u32 %s191_s13, 4  ;;  %p890_p13 = pnand %p645_p10, %p862_p5  ;;  %s894_s14 = int_to_ptr.vmem [resolvable:$true] %s199_s14 }
  0x14   : > { %s896_s16 = scalar_lea.sflag [#allocation3], %s187_s7  ;;  %s686_s17 = scalar_lea.hbm %s886_s12, 1024 }
  0x15   : > { %p687_p0 = scmp.ne.s32.totalorder %s886_s12, %s686_s17  ;;  %p688_p1 = pneg %p890_p13 }
  0x16   : > { %s691_s26 = scalar_lea.hbm %s1036_s0, 2048  ;;  %p692_p4 = scmp.lt.u32.totalorder %s886_s12, %s1036_s0 }
  0x17   : > { %p689_p2 = pnand %p688_p1, %p687_p0  ;;  %p693_p5 = scmp.lt.u32.totalorder %s691_s26, %s686_s17 }
  0x18   : > { %p695_p8 = scmp.lt.u32.totalorder %s686_s17, %s886_s12 }
  0x19   : > { %p690_p3 = pneg %p689_p2  ;;  %p694_p7 = por %p693_p5, %p692_p4 }
  0x1b   : > { %p696_p10 = por %p695_p8, %p694_p7 }
  0x1d   : > { %p697_p9 = pnand %p696_p10, %p690_p3 }
  0x1f   : > { %700 = shalt.err (!%p697_p9)
}
  0x20   : > { %s701_s7 = scalar_lea.vmem %s894_s14, 1024  ;;  %s784_s9 = smov [#allocation2]  }
  0x21   : > { %p702_p0 = scmp.ne.s32.totalorder %s894_s14, %s701_s7  ;;  %s706_s10 = sshll.u32 %s784_s9, 4  ;;  %s707_s10 = int_to_ptr.vmem [resolvable:$false] %s706_s10 }
  0x22   : > { %s708_s11 = scalar_lea.vmem %s707_s10, 2048  ;;  %p709_p11 = scmp.lt.s32.totalorder %s894_s14, %s707_s10 }
  0x23   : > { %p704_p2 = pnand %p702_p0, %p688_p1  ;;  %p710_p4 = scmp.lt.s32.totalorder %s708_s11, %s701_s7 }
  0x25   : > { %p705_p12 = pneg %p704_p2  ;;  %p711_p5 = por %p710_p4, %p709_p11 }
  0x27   : > { %p712_p7 = pnand %p711_p5, %p705_p12 }
  0x29   : > { %715 = shalt.err (!%p712_p7)
}
  0x2a   : > { %s785_s13 = smov 256   ;;  %s786_s17 = smov 16  }
  0x2b   : > { %640 = dma.hbm_to_vmem [thread:$0]  (!%p890_p13), %s886_s12, 1024, %s894_s14, %s896_s16, %s785_s13, %s785_s13, %s786_s17  }
  0x2c   : > { %p596_p9 = scmp.ge.s32.totalorder %s782_s21, 1  ;;  %p207_p1 = scmp.lt.s32.totalorder %s782_s21, 3 }
  0x2e   : > { %p208_p3 = pnand %p596_p9, %p207_p1 }
  0x2f   : > { %s927_s23 = sand.u32 (!%p208_p3), 1, %s774_s19  }
  0x30   : > { %211 = sbr.rel (%p208_p3) target bundleno = 790 (0x316), region = 40  ;;  %s597_s25 = sshll.u32 (!%p208_p3), %s927_s23, 6 }
  0x31   : > { %s214_s26 = scalar_lea.sflag (!%p208_p3), [#allocation3], %s927_s23  ;;  %s217_s28 = scalar_lea.vmem (!%p208_p3), [#allocation2], %s597_s25 }
  0x37   : > { %761 = dma.done.wait (%p866_p6), %s214_s26, 1024  }
  0x38   : > { %763 = vsyncadd (%p866_p6), %s214_s26, 4294966272  ;;  %v937_v0 = vld [vmem:[%s217_s28 + $0x20] sm:$0xff]  ;;  %v939_v1 = vld [vmem:[%s217_s28 + $0x28] sm:$0xff]  ;;  %v787_v15 = vmov 0.0|0.0   ;;  %vm788_vm0 = vmmov 0   ;;  %v789_v16 = vmov 0.0   ;;  %v279_v17 = vlaneseq }
  0x39   : > { %v941_v2 = vld [vmem:[%s217_s28] sm:$0xff]  ;;  %v260_v3 = vadd.f32 %v939_v1, %v937_v0  ;;  %v945_v4 = vld [vmem:[%s217_s28 + $0x8] sm:$0xff]  ;;  %v947_v5 = vld [vmem:[%s217_s28 + $0x30] sm:$0xff]  ;;  %630 = vmatprep.subr.bf16.mxu0 %v787_v15  ;;  %622 = vmatprep.mubr.msk.f32.mxu0 %vm788_vm0, %v789_v16  ;;  %vm290_vm1 = vcmask 130112   ;;  %vm301_vm2 = vcmask 1041409   ;;  %vm303_vm3 = vcmask 130048  }
  0x3a   : > { %v949_v6 = vld [vmem:[%s217_s28 + $0x38] sm:$0xff]  ;;  %v254_v7 = vadd.f32 %v945_v4, %v941_v2  ;;  %v953_v8 = vld [vmem:[%s217_s28 + $0x10] sm:$0xff]  ;;  %v266_v12 = vld [vmem:[%s1037_s1] sm:$0xff]  ;;  %625 = vmatprep.subr.mxu1 %v789_v16  ;;  %627 = vmatprep.mubr.msk.f32.mxu1 %vm788_vm0, %v789_v16  ;;  %v280_v18 = vand.u32 127, %v279_v17  ;;  %v282_v19 = vshrl.u32 %v279_v17, 7  ;;  %vm385_vm4 = vcmask 64512  }
  0x3b   : > { %v955_v9 = vld [vmem:[%s217_s28 + $0x18] sm:$0xff]  ;;  %261 = vadd.xlane.f32.xlu1 %v260_v3  ;;  %v263_v10 = vadd.f32 %v949_v6, %v947_v5  ;;  %v267_v13 = vld [vmem:[%s1037_s1 + $0x8] sm:$0xff]  ;;  %v377_v34 = vld [vmem:[%s1039_s3] sm:$0xff]  ;;  %s243_s13 = scalar_lea.vmem [#allocation5], %s597_s25  ;;  %s612_s26 = sshll.u32 %s844_s22, 10 }
  0x3c   : > { %255 = vadd.xlane.f32.xlu0 %v254_v7  ;;  %v257_v11 = vadd.f32 %v955_v9, %v953_v8  ;;  %v631_v14 = vpack.c.bf16 %v267_v13, %v266_v12  ;;  %v285_v20 = vadd.s32 4294967288, %v280_v18  ;;  %v283_v22 = vsub.s32 %v280_v18, %v282_v19  ;;  %626 = vmatpush3.msra.mxu1 %v377_v34  ;;  %v599_v35 = vld [vmem:[%s1038_s2] ss:$0 sm:$0xff]  ;;  %s516_s17 = sshll.u32 %s243_s13, 4  ;;  %s990_s29 = scalar_lea.hbm %s1041_s5, %s612_s26  ;;  %s985_s17 = int_to_ptr.vmem [resolvable:$true] %s516_s17 }
  0x3d   : > { %v601_v40 = vld [vmem:[%s1040_s4] ss:$0 sm:$0xff]  ;;  %v465_v47 = vsub.s32 0, %v282_v19  ;;  %v476_v50 = vsub.s32 1, %v282_v19  ;;  %s502_s22 = scalar_lea.sflag [#allocation4], %s927_s23  ;;  %s716_s12 = scalar_lea.vmem %s985_s17, 1024 }
  0x3e   : > { %632 = vmatpush3.bf16.msra.mxu0 %v631_v14  ;;  %v288_v24 = vsub.s32 %v285_v20, %v282_v19  ;;  %p717_p6 = scmp.ne.s32.totalorder %s985_s17, %s716_s12  ;;  %p1048_p11 = scmp.ne.s32.totalorder %s1045_s30, 0 }
  0x3f   : > { %264 = vadd.xlane.f32.xlu1 %v263_v10  ;;  %s790_s14 = smov [#allocation5]  }
  0x40   : > { %258 = vadd.xlane.f32.xlu0 %v257_v11  ;;  %p718_p12 = pnand %p717_p6, %p1048_p11  ;;  %s720_s15 = sshll.u32 %s790_s14, 4  ;;  %s721_s15 = int_to_ptr.vmem [resolvable:$false] %s720_s15 }
  0x41   : > { %s722_s16 = scalar_lea.vmem %s721_s15, 2048  ;;  %p723_p8 = scmp.lt.s32.totalorder %s985_s17, %s721_s15 }
  0x42   : > { %p719_p13 = pneg %p718_p12  ;;  %p724_p10 = scmp.lt.s32.totalorder %s722_s16, %s716_s12 }
  0x44   : > { %p725_p0 = por %p724_p10, %p723_p8 }
  0x46   : > { %p726_p2 = pnand %p725_p0, %p719_p13 }
  0xc8   : > { %v262_v21 = vpop.xlane.xlu1 %261 }
  0xc9   : > { %v256_v23 = vpop.xlane.xlu0 %255  ;;  %v295_v26 = vrot.slane %v262_v21, %v283_v22 }
  0xca   : > { %v284_v29 = vrot.slane %v256_v23, %v283_v22 }
  0xcc   : > { %v265_v25 = vpop.xlane.xlu1 %264 }
  0xcd   : > { %v299_v27 = vrot.slane %v265_v25, %v288_v24  ;;  %v259_v28 = vpop.xlane.xlu0 %258 }
  0xce   : > { %v289_v30 = vrot.slane %v259_v28, %v288_v24 }
  0xcf   : > { %v300_v31 = vsel %vm290_vm1, %v299_v27, %v295_v26 }
  0xd0   : > { %v291_v32 = vsel %vm290_vm1, %v289_v30, %v284_v29 }
  0xd1   : > { %v302_v33 = vsel %vm301_vm2, %v300_v31, %v291_v32 }
  0xd2   : > { %623 = vmatmul.mubr.msk.f32.vlgmr.msra.gmra.mrb[0].mxu0 %vm303_vm3, %v302_v33 }
 0x1a5   : > { %v372_v36 = vpop.f32.mrb[0].mxu0 }
 0x1a6   : > { %v373_v37 = vadd.f32 %v599_v35, %v372_v36  ;;  %v624_v38 = vpop.f32.mrb[1].mxu0 }
 0x1a8   : > { %v376_v39 = vmax.f32 %v373_v37, 0.0 }
 0x1aa   : > { %628 = vmatmul.mubr.msk.f32.vlgmr.msra.gmra.mrb[0].mxu1 %vm385_vm4, %v376_v39 }
 0x27d   : > { %v455_v41 = vpop.f32.mrb[0].mxu1 }
 0x27e   : > { %v456_v42 = vadd.f32 %v601_v40, %v455_v41  ;;  %v629_v43 = vpop.f32.mrb[1].mxu1 }
 0x280   : > { %v459_v44 = vadd.f32 3.0, %v456_v42 }
 0x282   : > { %v460_v45 = vmax.f32 %v459_v44, 0.0 }
 0x284   : > { %v461_v46 = vmin.f32 %v460_v45, 6.0 }
 0x286   : > { %v462_v48 = vmul.f32 0.16666667, %v461_v46 }
 0x288   : > { %v466_v49 = vrot.slane %v462_v48, %v465_v47  ;;  %v477_v51 = vrot.slane %v462_v48, %v476_v50 }
 0x28a   : > { %472 = vbcast.lane.b32.xlu1 %v466_v49, 264  ;;  %468 = vbcast.lane.b32.xlu0 %v466_v49, 256 }
 0x28e   : > { %479 = vbcast.lane.b32.xlu1 %v477_v51, 256 }
 0x292   : > { %483 = vbcast.lane.b32.xlu1 %v477_v51, 264 }
 0x2fc   : > { %v473_v52 = vpop.permute.xlu1 %472  ;;  %v469_v53 = vpop.permute.xlu0 %468 }
 0x2fd   : > { %v487_v54 = vmul.f32 %v473_v52, %v953_v8  ;;  %v488_v55 = vmul.f32 %v473_v52, %v955_v9  ;;  %v485_v56 = vmul.f32 %v469_v53, %v941_v2  ;;  %v486_v57 = vmul.f32 %v469_v53, %v945_v4 }
 0x2ff   : > { %495 = vst [vmem:[%s243_s13 + $0x10] sm:$0xff] %v487_v54  ;;  %496 = vst [vmem:[%s243_s13 + $0x18] sm:$0xff] %v488_v55 }
 0x300   : > { %493 = vst [vmem:[%s243_s13] sm:$0xff] %v485_v56  ;;  %494 = vst [vmem:[%s243_s13 + $0x8] sm:$0xff] %v486_v57  ;;  %v480_v58 = vpop.permute.xlu1 %479 }
 0x301   : > { %v489_v59 = vmul.f32 %v480_v58, %v937_v0  ;;  %v490_v60 = vmul.f32 %v480_v58, %v939_v1 }
 0x303   : > { %497 = vst [vmem:[%s243_s13 + $0x20] sm:$0xff] %v489_v59  ;;  %498 = vst [vmem:[%s243_s13 + $0x28] sm:$0xff] %v490_v60 }
 0x304   : > { %v484_v61 = vpop.permute.xlu1 %483 }
 0x305   : > { %v491_v62 = vmul.f32 %v484_v61, %v947_v5  ;;  %v492_v63 = vmul.f32 %v484_v61, %v949_v6 }
 0x307   : > { %499 = vst [vmem:[%s243_s13 + $0x30] sm:$0xff] %v491_v62  ;;  %500 = vst [vmem:[%s243_s13 + $0x38] sm:$0xff] %v492_v63 }
 0x308   : > { %729 = shalt.err (!%p726_p2)
}
 0x309   : > { %s730_s8 = scalar_lea.hbm %s990_s29, 1024  ;;  %s734_s10 = scalar_lea.hbm %s1041_s5, 2048 }
 0x30a   : > { %p731_p4 = scmp.ne.s32.totalorder %s990_s29, %s730_s8  ;;  %p735_p9 = scmp.lt.u32.totalorder %s990_s29, %s1041_s5 }
 0x30b   : > { %p736_p1 = scmp.lt.u32.totalorder %s734_s10, %s730_s8  ;;  %p738_p6 = scmp.lt.u32.totalorder %s730_s8, %s990_s29 }
 0x30c   : > { %p732_p5 = pnand %p731_p4, %p1048_p11 }
 0x30d   : > { %p737_p3 = por %p736_p1, %p735_p9 }
 0x30e   : > { %p733_p7 = pneg %p732_p5 }
 0x30f   : > { %p739_p12 = por %p738_p6, %p737_p3 }
 0x311   : > { %p740_p13 = pnand %p739_p12, %p733_p7 }
 0x313   : > { %743 = shalt.err (!%p740_p13)
}
 0x314   : > { %s791_s26 = smov 256   ;;  %s792_s25 = smov 16  }
 0x315   : > { %635 = dma.vmem_to_hbm [thread:$0]  (%p1048_p11), %s985_s17, 1024, %s990_s29, %s502_s22, %s791_s26, %s791_s26, %s792_s25  }
 0x316 PF: > { %s531_s28 = sand.u32 1, %s770_s18   ;;  %p1049_p8 = scmp.ne.s32.totalorder %s1046_s6, 0 }
 0x317   : > { %p1050_p10 = scmp.ge.s32.totalorder %s782_s21, 2  ;;  %s532_s12 = scalar_lea.sflag [#allocation4], %s531_s28 }
 0x319   : > { %p642_p0 = pnand %p1050_p10, %p1049_p8 }
 0x31b   : > { %765 = dma.done.wait (!%p642_p0), %s532_s12, 1024  }
 0x31c   : > { %767 = vsyncadd (!%p642_p0), %s532_s12, 4294966272  ;;  %p18_p2 = scmp.ge.s32.totalorder %s848_s24, 4   ;;  %s1051_s18 = smov %s774_s19 }
 0x31d   : > { %s1052_s19 = smov %s778_s20  ;;  %s1053_s20 = smov %s860_s27 }
 0x31e   : > { %s1054_s21 = smov %s848_s24  ;;  %20 = sbr.rel (!%p18_p2) target bundleno = 5 (0x5), region = 85 }
 0x325   :  { %537 = vsyncpa [#allocation3], 1 }
 0x326   :  { %539 = vsyncpa [#allocation3 + $0x1], 1 }
 0x327   :  { %540 = vsyncpa [#allocation4], 1 }
 0x328   :  { %542 = vsyncpa [#allocation4 + $0x1], 1 }

</bundles_post_ra>
